<compile_context>
chip_gen: v5e
topology: v5e:2x2
jax: 0.10.0
libtpu: 0.0.40
codegen_flags: <defaults>
</compile_context>

<pallas_src>
import functools

import jax
import jax.numpy as jnp
from jax.experimental import pallas as pl
from jax.experimental.pallas import tpu as pltpu


_EPS = 1e-6
_TARGET_TILE_BYTES = 2 * 1024 * 1024   # ~2 MiB per streamed (B, TD) feature tile
_XLA_FASTPATH_BYTES = 512 * 1024       # below this per input, plain XLA wins


def _pick_feature_tile(b, d, itemsize, target_bytes=_TARGET_TILE_BYTES):
    """Lane-aligned feature-tile width giving ~target_bytes per (B, TD) tile."""
    if d <= 128:
        return d                                    # full width (== array dim)
    td = (target_bytes // max(1, b * itemsize)) // 128 * 128
    td = max(128, td)
    return min(td, (d // 128) * 128)                # never wider than lane-aligned d


def _gram_pair_kernel(x1_ref, x2_ref, out_ref, acc_ref, *, d1, d2, kt1, kt2):
    g = pl.program_id(0)   # which input (0 -> x1, 1 -> x2); "parallel" axis
    k = pl.program_id(1)   # feature-tile index; "arbitrary" (reduction) axis

    @pl.when(k == 0)
    def _():
        acc_ref[...] = jnp.zeros_like(acc_ref)

    def accumulate(x_ref, d, kt):
        x = x_ref[...]                               # (B, TD), native dtype
        td = x.shape[-1]
        if d % td != 0:
            # Mask the columns past the end of this input (partial tail tile).
            col = jax.lax.broadcasted_iota(jnp.int32, x.shape, 1)
            x = jnp.where(col < (d - k * td), x, jnp.zeros_like(x))
        # (B, B) partial raw Gram on the MXU; centering deferred to finalize.
        acc_ref[...] += jax.lax.dot_general(
            x, x,
            dimension_numbers=(((1,), (1,)), ((), ())),
            preferred_element_type=jnp.float32)

    @pl.when(jnp.logical_and(g == 0, k < kt1))
    def _():
        accumulate(x1_ref, d1, kt1)

    @pl.when(jnp.logical_and(g == 1, k < kt2))
    def _():
        accumulate(x2_ref, d2, kt2)

    @pl.when(k == pl.num_programs(1) - 1)
    def _():
        gm = acc_ref[...]                            # raw Gram X @ X.T (f32)
        bsz = gm.shape[0]
        # Deferred batch-centering (exact):
        #   Gc = G - (r 1^T + 1 r^T)/B + (sum(G)/B^2) 11^T,   r = G @ 1.
        r_col = jnp.sum(gm, axis=1, keepdims=True)   # (B, 1)
        r_row = jnp.sum(gm, axis=0, keepdims=True)   # (1, B)  (G symmetric)
        s = jnp.sum(r_col)
        gc = gm - (r_col + r_row) * (1.0 / bsz) + s * (1.0 / (bsz * bsz))
        # Row norms straight off the diagonal: diag(Gc)[i] = ||centered row i||^2.
        row = jax.lax.broadcasted_iota(jnp.int32, (bsz, bsz), 0)
        col = jax.lax.broadcasted_iota(jnp.int32, (bsz, bsz), 1)
        eye = (row == col).astype(jnp.float32)
        sq_col = jnp.maximum(jnp.sum(gc * eye, axis=1, keepdims=True), 0.0)
        sq_row = jnp.maximum(jnp.sum(gc * eye, axis=0, keepdims=True), 0.0)
        scale_col = 1.0 / (jnp.sqrt(sq_col) + _EPS)  # (B, 1)
        scale_row = 1.0 / (jnp.sqrt(sq_row) + _EPS)  # (1, B)
        out_ref[0] = gc * scale_col * scale_row      # normalized (B, B) Gram


def _normalized_gram_pair(x1, x2, target_tile_bytes=_TARGET_TILE_BYTES):
    """One fused pallas_call producing both normalized Grams: (2, B, B) f32."""
    b, d1 = x1.shape
    _, d2 = x2.shape
    td1 = _pick_feature_tile(b, d1, x1.dtype.itemsize, target_tile_bytes)
    td2 = _pick_feature_tile(b, d2, x2.dtype.itemsize, target_tile_bytes)
    kt1 = pl.cdiv(d1, td1)
    kt2 = pl.cdiv(d2, td2)
    kt = max(kt1, kt2)

    # The input that is not being streamed (wrong g, or k past its own tile
    # count) keeps a constant block index, so the pipeline does not re-DMA it.
    def x1_map(g, k):
        return (0, (1 - g) * jnp.minimum(k, kt1 - 1))

    def x2_map(g, k):
        return (0, g * jnp.minimum(k, kt2 - 1))

    # Real VMEM need: double-buffered input tiles + accumulator + output.
    vmem_need = (2 * b * td1 * x1.dtype.itemsize
                 + 2 * b * td2 * x2.dtype.itemsize
                 + b * b * 4                       # f32 accumulator scratch
                 + 2 * b * b * 4)                  # double-buffered (1,B,B) out
    vmem_limit = int(min(48 << 20, max(16 << 20, vmem_need + (8 << 20))))

    kernel = functools.partial(_gram_pair_kernel, d1=d1, d2=d2, kt1=kt1, kt2=kt2)
    return pl.pallas_call(
        kernel,
        out_shape=jax.ShapeDtypeStruct((2, b, b), jnp.float32),
        grid_spec=pltpu.PrefetchScalarGridSpec(
            num_scalar_prefetch=0,
            grid=(2, kt),
            in_specs=[pl.BlockSpec((b, td1), x1_map),
                      pl.BlockSpec((b, td2), x2_map)],
            out_specs=pl.BlockSpec((1, b, b), lambda g, k: (g, 0, 0)),
            scratch_shapes=[pltpu.VMEM((b, b), jnp.float32)],
        ),
        compiler_params=pltpu.CompilerParams(
            # g: the two inputs (independent -> sharded across TCs on megacore);
            # k: feature-tile reduction axis.
            dimension_semantics=("parallel", "arbitrary"),
            vmem_limit_bytes=vmem_limit,
        ),
    )(x1, x2)


def _diff_loss_xla(input1, input2):
    """Pure-XLA DiffLoss (fast path for tiny inputs; also the reference)."""
    b = input1.shape[0]
    x1 = input1.reshape(b, -1).astype(jnp.float32)
    x2 = input2.reshape(b, -1).astype(jnp.float32)
    x1 = x1 - jnp.mean(x1, axis=0, keepdims=True)
    x2 = x2 - jnp.mean(x2, axis=0, keepdims=True)
    n1 = jnp.sqrt(jnp.sum(x1 * x1, axis=1, keepdims=True))
    n2 = jnp.sqrt(jnp.sum(x2 * x2, axis=1, keepdims=True))
    x1 = x1 / (n1 + _EPS)
    x2 = x2 / (n2 + _EPS)
    return jnp.mean((x1.T @ x2) ** 2)


diff_loss_reference = _diff_loss_xla


def diff_loss(input1, input2, use_pallas=None,
              target_tile_bytes=_TARGET_TILE_BYTES):
    """Pallas implementation of DiffLoss.forward (scalar f32)."""
    b = input1.shape[0]
    x1 = input1.reshape(b, -1)          # native dtype; MXU consumes it directly
    x2 = input2.reshape(b, -1)
    d1, d2 = x1.shape[1], x2.shape[1]

    if use_pallas is None:
        # Launch + pipeline setup cannot be amortized at tiny sizes.
        use_pallas = max(x1.size * x1.dtype.itemsize,
                         x2.size * x2.dtype.itemsize) >= _XLA_FASTPATH_BYTES
    if not use_pallas:
        return _diff_loss_xla(x1, x2)

    grams = _normalized_gram_pair(x1, x2, target_tile_bytes)
    # mean((x1n^T x2n)^2) == sum(G1n * G2n) / (D1*D2): tiny (B,B) reduce in XLA.
    return jnp.sum(grams[0] * grams[1]) / jnp.float32(d1 * d2)


if __name__ == "__main__":
    key = jax.random.PRNGKey(0)
    k1, k2, k3, k4 = jax.random.split(key, 4)

    # Case A: typical shapes, D1 != D2, lane-aligned feature widths.
    a1 = jax.random.normal(k1, (8, 4, 16, 16), dtype=jnp.float32)   # D1 = 1024
    a2 = jax.random.normal(k2, (8, 2, 16, 16), dtype=jnp.float32)   # D2 = 512

    # Case B: ragged feature width (not a multiple of 128) + unequal tile counts.
    b1 = jax.random.normal(k3, (8, 3, 10, 10), dtype=jnp.float32)   # D1 = 300
    b2 = jax.random.normal(k4, (8, 4, 16, 16), dtype=jnp.float32)   # D2 = 1024

    for i1, i2 in ((a1, a2), (b1, b2)):
        out = jax.block_until_ready(diff_loss(i1, i2, use_pallas=True))
        ref = diff_loss_reference(i1, i2)
        assert jnp.isfinite(out), f"non-finite kernel output: {out}"
        assert jnp.allclose(out, ref, rtol=1e-3, atol=1e-7), (out, ref)

    # Auto path (tiny inputs take the XLA fast path).
    out_auto = jax.block_until_ready(diff_loss(a1, a2))
    ref_auto = diff_loss_reference(a1, a2)
    assert jnp.allclose(out_auto, ref_auto, rtol=1e-3, atol=1e-7), (out_auto, ref_auto)

    print("KERNEL_OK")
</pallas_src>

<mosaic_0001>
module attributes {stable_mosaic.version = 11 : i64} {
  func.func @_gram_pair_kernel(%arg0: i32, %arg1: i32, %arg2: memref<8x1024xf32, #tpu.memory_space<vmem>>, %arg3: memref<8x512xf32, #tpu.memory_space<vmem>>, %arg4: memref<1x8x8xf32, #tpu.memory_space<vmem>>, %arg5: memref<8x8xf32, #tpu.memory_space<vmem>>) attributes {dimension_semantics = [#tpu.dimension_semantics<parallel>, #tpu.dimension_semantics<arbitrary>], iteration_bounds = array<i64: 2, 1>, scalar_prefetch = 0 : i64, scratch_operands = 1 : i64, tpu.core_type = #tpu.core_type<tc>, window_params = [{transform_indices = @transform_0, window_bounds = array<i64: 8, 1024>}, {transform_indices = @transform_1, window_bounds = array<i64: 8, 512>}, {transform_indices = @transform_2, window_bounds = array<i64: 1, 8, 8>}]} {
    %c0_i32 = arith.constant 0 : i32
    %0 = arith.cmpi eq, %arg1, %c0_i32 : i32
    %1 = arith.extui %0 : i1 to i32
    %c0_i32_0 = arith.constant 0 : i32
    %2 = arith.cmpi ne, %1, %c0_i32_0 : i32
    scf.if %2 {
      %cst = arith.constant 0.000000e+00 : f32
      %16 = vector.broadcast %cst : f32 to vector<8x8xf32>
      %c0 = arith.constant 0 : index
      %c0_8 = arith.constant 0 : index
      %17 = vector.load %arg5[%c0, %c0_8] : memref<8x8xf32, #tpu.memory_space<vmem>>, vector<8x8xf32>
      tpu.vector_store %arg5[%c0, %c0_8], %16 {strides = array<i32>} : memref<8x8xf32, #tpu.memory_space<vmem>>, vector<8x8xf32>,
    } else {
    }
    %c0_i32_1 = arith.constant 0 : i32
    %3 = arith.cmpi eq, %arg0, %c0_i32_1 : i32
    %c1_i32 = arith.constant 1 : i32
    %4 = arith.cmpi slt, %arg1, %c1_i32 : i32
    %5 = arith.andi %3, %4 : i1
    %6 = arith.extui %5 : i1 to i32
    %c0_i32_2 = arith.constant 0 : i32
    %7 = arith.cmpi ne, %6, %c0_i32_2 : i32
    scf.if %7 {
      %c0 = arith.constant 0 : index
      %c0_8 = arith.constant 0 : index
      %16 = vector.load %arg2[%c0, %c0_8] : memref<8x1024xf32, #tpu.memory_space<vmem>>, vector<8x1024xf32>
      %c0_9 = arith.constant 0 : index
      %c0_10 = arith.constant 0 : index
      %17 = vector.load %arg5[%c0_9, %c0_10] : memref<8x8xf32, #tpu.memory_space<vmem>>, vector<8x8xf32>
      %cst = arith.constant dense<0.000000e+00> : vector<8x8xf32>
      %18 = tpu.matmul %16, %16, %cst {dimension_numbers = #tpu.dot_dimension_numbers<[1], [1], [0], [0], [0, 0, 1, 0], [], []>} : vector<8x1024xf32>, vector<8x1024xf32>, vector<8x8xf32> -> vector<8x8xf32>
      %19 = arith.addf %17, %18 : vector<8x8xf32>
      %c0_11 = arith.constant 0 : index
      %c0_12 = arith.constant 0 : index
      %20 = vector.load %arg5[%c0_11, %c0_12] : memref<8x8xf32, #tpu.memory_space<vmem>>, vector<8x8xf32>
      tpu.vector_store %arg5[%c0_11, %c0_12], %19 {strides = array<i32>} : memref<8x8xf32, #tpu.memory_space<vmem>>, vector<8x8xf32>,
    } else {
    }
    %c1_i32_3 = arith.constant 1 : i32
    %8 = arith.cmpi eq, %arg0, %c1_i32_3 : i32
    %c1_i32_4 = arith.constant 1 : i32
    %9 = arith.cmpi slt, %arg1, %c1_i32_4 : i32
    %10 = arith.andi %8, %9 : i1
    %11 = arith.extui %10 : i1 to i32
    %c0_i32_5 = arith.constant 0 : i32
    %12 = arith.cmpi ne, %11, %c0_i32_5 : i32
    scf.if %12 {
      %c0 = arith.constant 0 : index
      %c0_8 = arith.constant 0 : index
      %16 = vector.load %arg3[%c0, %c0_8] : memref<8x512xf32, #tpu.memory_space<vmem>>, vector<8x512xf32>
      %c0_9 = arith.constant 0 : index
      %c0_10 = arith.constant 0 : index
      %17 = vector.load %arg5[%c0_9, %c0_10] : memref<8x8xf32, #tpu.memory_space<vmem>>, vector<8x8xf32>
      %cst = arith.constant dense<0.000000e+00> : vector<8x8xf32>
      %18 = tpu.matmul %16, %16, %cst {dimension_numbers = #tpu.dot_dimension_numbers<[1], [1], [0], [0], [0, 0, 1, 0], [], []>} : vector<8x512xf32>, vector<8x512xf32>, vector<8x8xf32> -> vector<8x8xf32>
      %19 = arith.addf %17, %18 : vector<8x8xf32>
      %c0_11 = arith.constant 0 : index
      %c0_12 = arith.constant 0 : index
      %20 = vector.load %arg5[%c0_11, %c0_12] : memref<8x8xf32, #tpu.memory_space<vmem>>, vector<8x8xf32>
      tpu.vector_store %arg5[%c0_11, %c0_12], %19 {strides = array<i32>} : memref<8x8xf32, #tpu.memory_space<vmem>>, vector<8x8xf32>,
    } else {
    }
    %c0_i32_6 = arith.constant 0 : i32
    %13 = arith.cmpi eq, %arg1, %c0_i32_6 : i32
    %14 = arith.extui %13 : i1 to i32
    %c0_i32_7 = arith.constant 0 : i32
    %15 = arith.cmpi ne, %14, %c0_i32_7 : i32
    scf.if %15 {
      %c0 = arith.constant 0 : index
      %c0_8 = arith.constant 0 : index
      %16 = vector.load %arg5[%c0, %c0_8] : memref<8x8xf32, #tpu.memory_space<vmem>>, vector<8x8xf32>
      %cst = arith.constant dense<0.000000e+00> : vector<8xf32>
      %17 = vector.multi_reduction <add>, %16, %cst [1] : vector<8x8xf32> to vector<8xf32>
      %18 = vector.shape_cast %17 : vector<8xf32> to vector<8x1xf32>
      %cst_9 = arith.constant dense<0.000000e+00> : vector<8xf32>
      %19 = vector.multi_reduction <add>, %16, %cst_9 [0] : vector<8x8xf32> to vector<8xf32>
      %20 = vector.shape_cast %19 : vector<8xf32> to vector<1x8xf32>
      %21 = vector.shape_cast %18 : vector<8x1xf32> to vector<1x8x1xf32>
      %cst_10 = arith.constant dense<0.000000e+00> : vector<1xf32>
      %22 = vector.multi_reduction <add>, %21, %cst_10 [1, 2] : vector<1x8x1xf32> to vector<1xf32>
      %23 = vector.shape_cast %22 : vector<1xf32> to vector<1x1x1xf32>
      %24 = vector.extract %23[0, 0, 0] : f32 from vector<1x1x1xf32>
      %25 = vector.broadcast %18 : vector<8x1xf32> to vector<8x8xf32>
      %26 = vector.broadcast %20 : vector<1x8xf32> to vector<8x8xf32>
      %27 = arith.addf %25, %26 : vector<8x8xf32>
      %cst_11 = arith.constant 1.250000e-01 : f32
      %28 = vector.broadcast %cst_11 : f32 to vector<8x8xf32>
      %29 = arith.mulf %27, %28 : vector<8x8xf32>
      %30 = arith.subf %16, %29 : vector<8x8xf32>
      %cst_12 = arith.constant 1.562500e-02 : f32
      %31 = arith.mulf %24, %cst_12 : f32
      %32 = vector.broadcast %31 : f32 to vector<8x8xf32>
      %33 = arith.addf %30, %32 : vector<8x8xf32>
      %34 = tpu.iota {dimensions = array<i32: 0>} : vector<8x8xi32>
      %35 = tpu.iota {dimensions = array<i32: 1>} : vector<8x8xi32>
      %36 = arith.cmpi eq, %34, %35 : vector<8x8xi32>
      %37 = arith.extui %36 : vector<8x8xi1> to vector<8x8xi32>
      %38 = arith.sitofp %37 : vector<8x8xi32> to vector<8x8xf32>
      %39 = arith.mulf %33, %38 : vector<8x8xf32>
      %cst_13 = arith.constant dense<0.000000e+00> : vector<8xf32>
      %40 = vector.multi_reduction <add>, %39, %cst_13 [1] : vector<8x8xf32> to vector<8xf32>
      %41 = vector.shape_cast %40 : vector<8xf32> to vector<8x1xf32>
      %cst_14 = arith.constant 0.000000e+00 : f32
      %42 = vector.broadcast %cst_14 : f32 to vector<8x1xf32>
      %43 = arith.maximumf %41, %42 : vector<8x1xf32>
      %44 = arith.mulf %33, %38 : vector<8x8xf32>
      %cst_15 = arith.constant dense<0.000000e+00> : vector<8xf32>
      %45 = vector.multi_reduction <add>, %44, %cst_15 [0] : vector<8x8xf32> to vector<8xf32>
      %46 = vector.shape_cast %45 : vector<8xf32> to vector<1x8xf32>
      %cst_16 = arith.constant 0.000000e+00 : f32
      %47 = vector.broadcast %cst_16 : f32 to vector<1x8xf32>
      %48 = arith.maximumf %46, %47 : vector<1x8xf32>
      %49 = math.sqrt %43 : vector<8x1xf32>
      %cst_17 = arith.constant 9.99999997E-7 : f32
      %50 = vector.broadcast %cst_17 : f32 to vector<8x1xf32>
      %51 = arith.addf %49, %50 : vector<8x1xf32>
      %cst_18 = arith.constant 1.000000e+00 : f32
      %52 = vector.broadcast %cst_18 : f32 to vector<8x1xf32>
      %53 = arith.divf %52, %51 : vector<8x1xf32>
      %54 = math.sqrt %48 : vector<1x8xf32>
      %cst_19 = arith.constant 9.99999997E-7 : f32
      %55 = vector.broadcast %cst_19 : f32 to vector<1x8xf32>
      %56 = arith.addf %54, %55 : vector<1x8xf32>
      %cst_20 = arith.constant 1.000000e+00 : f32
      %57 = vector.broadcast %cst_20 : f32 to vector<1x8xf32>
      %58 = arith.divf %57, %56 : vector<1x8xf32>
      %59 = vector.broadcast %53 : vector<8x1xf32> to vector<8x8xf32>
      %60 = arith.mulf %33, %59 : vector<8x8xf32>
      %61 = vector.broadcast %58 : vector<1x8xf32> to vector<8x8xf32>
      %62 = arith.mulf %60, %61 : vector<8x8xf32>
      %c0_21 = arith.constant 0 : index
      %c0_22 = arith.constant 0 : index
      %c0_23 = arith.constant 0 : index
      %63 = vector.load %arg4[%c0_21, %c0_22, %c0_23] : memref<1x8x8xf32, #tpu.memory_space<vmem>>, vector<1x8x8xf32>
      %64 = vector.shape_cast %63 : vector<1x8x8xf32> to vector<8x8xf32>
      %65 = vector.shape_cast %62 : vector<8x8xf32> to vector<1x8x8xf32>
      tpu.vector_store %arg4[%c0_21, %c0_22, %c0_23], %65 {strides = array<i32>} : memref<1x8x8xf32, #tpu.memory_space<vmem>>, vector<1x8x8xf32>,
    } else {
    }
    return
  }
  func.func @transform_0(%arg0: i32, %arg1: i32) -> (i32, i32) {
    %c1_i32 = arith.constant 1 : i32
    %0 = arith.subi %c1_i32, %arg0 : i32
    %c0_i32 = arith.constant 0 : i32
    %1 = arith.minsi %arg1, %c0_i32 : i32
    %2 = arith.muli %0, %1 : i32
    %c0_i32_0 = arith.constant 0 : i32
    %c0_i32_1 = arith.constant 0 : i32
    return %c0_i32_0, %2 : i32, i32
  }
  func.func @transform_1(%arg0: i32, %arg1: i32) -> (i32, i32) {
    %c0_i32 = arith.constant 0 : i32
    %0 = arith.minsi %arg1, %c0_i32 : i32
    %1 = arith.muli %arg0, %0 : i32
    %c0_i32_0 = arith.constant 0 : i32
    %c0_i32_1 = arith.constant 0 : i32
    return %c0_i32_0, %1 : i32, i32
  }
  func.func @transform_2(%arg0: i32, %arg1: i32) -> (i32, i32, i32) {
    %c0_i32 = arith.constant 0 : i32
    %c0_i32_0 = arith.constant 0 : i32
    %c0_i32_1 = arith.constant 0 : i32
    return %arg0, %c0_i32, %c0_i32_0 : i32, i32, i32
  }
}

</mosaic_0001>

<bundles_post_ra>
// kernel: tpu_custom_call.1
= control target key start
LH: loop header
LB: loop body
LE: loop exit
PB: predicated region body
PF: predicated region fallthrough
CT: control target
= control target key end

     0   :  { %7 = vsyncpa [#allocation4], 0  ;;  %s1151_s0 = inlined_call_operand.hbm [shape: f32[8,1024], index: 0, kind: input, shape index: {}]   ;;  %s1152_s1 = inlined_call_operand.hbm [shape: f32[8,512], index: 1, kind: input, shape index: {}]   ;;  %s1153_s2 = inlined_call_operand.hbm [shape: f32[2,8,8], index: 2, kind: output, shape index: {}]  }
   0x1   :  { %9 = vsyncpa [#allocation4 + $0x1], 0 }
   0x2   :  { %10 = vsyncpa [#allocation7], 0 }
   0x3   :  { %12 = vsyncpa [#allocation7 + $0x1], 0 }
   0x4   :  { %13 = vsyncpa [#allocation5], 0 }
   0x5   :  { %15 = vsyncpa [#allocation5 + $0x1], 0  ;;  %s1020_s9 = smov 0   ;;  %s1022_s10 = smov 0  }
   0x6   :  { %s1024_s11 = smov 0   ;;  %s1026_s12 = smov 0  }
   0x7   :  { %s1028_s13 = smov 0   ;;  %s1030_s14 = smov 0  }
   0x8 LB: > { %s747_s15 = sadd.s32 4294967295, %s1000_s14   ;;  %s748_s16 = sadd.s32 4294967294, %s1000_s14   ;;  %s1000_s14 = sphi %s1030_s14, %s21_s14   ;;  %s996_s13 = sphi %s1028_s13, %s1160_s13   ;;  %s992_s12 = sphi %s1026_s12, %s1159_s12   ;;  %s988_s11 = sphi %s1024_s11, %s1158_s11   ;;  %s984_s10 = sphi %s1022_s10, %s1157_s10   ;;  %s980_s9 = sphi %s1020_s9, %s1156_s9  }
   0x9   : > { %s33_s17 = sadd.s32 1, %s996_s13  ;;  %s106_s18 = sadd.s32 1, %s988_s11 }
   0xa   : > { %p35_p0 = scmp.ge.s32.totalorder %s33_s17, 2  ;;  %p116_p1 = scmp.ne.s32.totalorder %s988_s11, %s984_s10 }
   0xb   : > { %p117_p2 = scmp.eq.s32.totalorder %s747_s15, 1  ;;  %p122_p3 = scmp.ne.s32.totalorder %s984_s10, %s980_s9 }
   0xc   : > { %s1162_s17 = smov (%p35_p0, %s33_s17), 0  ;;  %p123_p5 = scmp.eq.s32.totalorder %s748_s16, 1 }
   0xd   : > { %p1062_p4 = por %p117_p2, %p116_p1  ;;  %s103_s20 = ssub.s32 %s996_s13, %s1162_s17 }
   0xe   : > { %p750_p6 = scmp.ge.s32.totalorder %s1000_s14, 2  ;;  %p104_p7 = scmp.eq.s32.totalorder %s103_s20, 0 }
   0xf   : > { %p1069_p8 = por %p123_p5, %p122_p3  ;;  %p789_p9 = scmp.lt.s32.totalorder %s1000_s14, 2 }
  0x10   : > { %s1075_s22 = scalar_select %p104_p7, %s988_s11, %s106_s18  }
  0x11   : > { %p790_p10 = scmp.eq.s32.totalorder %s1000_s14, 0  ;;  %s158_s25 = sshll.u32 %s1151_s0, 4  ;;  %s159_s25 = int_to_ptr.hbm [resolvable:$true] %s158_s25 }
  0x12   : > { %s1002_s26 = smov [#allocation3]   ;;  %p753_p12 = scmp.ge.s32.totalorder %s1000_s14, 1 }
  0x13   : > { %s160_s27 = sshll.u32 %s1002_s26, 4  ;;  %p779_p11 = pnand %p790_p10, %p789_p9  ;;  %s161_s27 = int_to_ptr.vmem [resolvable:$true] %s160_s27 }
  0x14   : > { %p188_p13 = scmp.lt.s32.totalorder %s1000_s14, 3  ;;  %s181_s30 = sshll.u32 %s1152_s1, 4  ;;  %s182_s30 = int_to_ptr.hbm [resolvable:$true] %s181_s30 }
  0x15   : > { %781 = dma.hbm_to_vmem [thread:$0]  (!%p779_p11), %s159_s25, 1024, %s161_s27, [#allocation4]  }
  0x16   : > { %p189_p0 = pnand %p753_p12, %p188_p13  ;;  %s1003_s3 = smov [#allocation6]  }
  0x17   : > { %s183_s4 = sshll.u32 %s1003_s3, 4  ;;  %p792_p1 = scmp.eq.s32.totalorder (!%p189_p0), %s747_s15, 0  ;;  %s184_s4 = int_to_ptr.vmem [resolvable:$true] %s183_s4 }
  0x18   : > { %784 = dma.hbm_to_vmem [thread:$0]  (!%p779_p11), %s182_s30, 512, %s184_s4, [#allocation7]  }
  0x19   : > { %192 = sbr.rel (%p189_p0) target bundleno = 805 (0x325), region = 28 }
  0x1e   : > { %967 = dma.done.wait (%p792_p1), [#allocation4], 1024  }
  0x1f   : > { %969 = vsyncadd (%p792_p1), [#allocation4], 4294966272 }
  0x20   : > { %971 = dma.done.wait (%p792_p1), [#allocation7], 512  }
  0x21   : > { %973 = vsyncadd (%p792_p1), [#allocation7], 4294966784  ;;  %s232_s5 = sand.u32 1, %s984_s10   ;;  %vm248_vm0 = vcmask 64512   ;;  %p250_p2 = scmp.eq.s32.totalorder %s992_s12, 0  ;;  %v1004_v0 = vmov 0.0  }
  0x22   : > { %s1092_s6 = sshll.u32 %s232_s5, 3  ;;  %249 = vst.msk [vmem:[#allocation2] sm:$0xff] %vm248_vm0, %v1004_v0  ;;  %v258_v1 = vld [vmem:[#allocation3 + $0x10] sm:$0xff] (%p250_p2)  ;;  %v256_v2 = vld [vmem:[#allocation3] sm:$0xff] (%p250_p2)  ;;  %v257_v3 = vld [vmem:[#allocation3 + $0x8] sm:$0xff] (%p250_p2) }
  0x23   : > { %s234_s7 = scalar_lea.vmem [#allocation8], %s1092_s6  ;;  %255 = sbr.rel (!%p250_p2) target bundleno = 185 (0xb9), region = 44  ;;  %320 = vmatpush.xpose.msra.mxu2 (%p250_p2), %v258_v1  ;;  %280 = vmatpush.xpose.msra.mxu0 (%p250_p2), %v256_v2  ;;  %v259_v4 = vld [vmem:[#allocation3 + $0x18] sm:$0xff] (%p250_p2)  ;;  %v262_v5 = vld [vmem:[#allocation3 + $0x30] sm:$0xff] (%p250_p2)  ;;  %v260_v6 = vld [vmem:[#allocation3 + $0x20] sm:$0xff] (%p250_p2) }
  0x24   : > { %300 = vmatpush.xpose.msra.mxu1 (%p250_p2), %v257_v3  ;;  %340 = vmatpush.xpose.msra.mxu3 (%p250_p2), %v259_v4  ;;  %v263_v7 = vld [vmem:[#allocation3 + $0x38] sm:$0xff] (%p250_p2)  ;;  %v261_v8 = vld [vmem:[#allocation3 + $0x28] sm:$0xff] (%p250_p2) }
  0x26   : > { %321 = vmatmul.f32.vlgmr.msra.gmra.mxu2 (%p250_p2), %v258_v1  ;;  %281 = vmatmul.f32.vlgmr.msra.gmra.mxu0 (%p250_p2), %v256_v2 }
  0x27   : > { %400 = vmatpush.xpose.msrb.mxu2 (%p250_p2), %v262_v5  ;;  %360 = vmatpush.xpose.msrb.mxu0 (%p250_p2), %v260_v6 }
  0x28   : > { %301 = vmatmul.f32.vlgmr.msra.gmra.mxu1 %v257_v3  ;;  %341 = vmatmul.f32.vlgmr.msra.gmra.mxu3 %v259_v4 }
  0x29   : > { %420 = vmatpush.xpose.msrb.mxu3 %v263_v7  ;;  %380 = vmatpush.xpose.msrb.mxu1 %v261_v8  ;;  %v264_v23 = vld [vmem:[#allocation2] sm:$0xff] }
  0x2e   : > { %401 = vmatmul.f32.vlgmr.msrb.gmra.mxu2 %v262_v5  ;;  %361 = vmatmul.f32.vlgmr.msrb.gmra.mxu0 %v260_v6 }
  0x30   : > { %421 = vmatmul.f32.vlgmr.msrb.gmra.mxu3 %v263_v7  ;;  %381 = vmatmul.f32.vlgmr.msrb.gmra.mxu1 %v261_v8 }
  0xa3   : > { %v282_v9 = vpop.f32.mrf.mxu0 }
  0xa5   : > { %v302_v10 = vpop.f32.mrf.mxu1 }
  0xa6   : > { %v303_v11 = vadd.f32 %v302_v10, %v282_v9 }
  0xa9   : > { %v322_v12 = vpop.f32.mrf.mxu2 }
  0xaa   : > { %v323_v13 = vadd.f32 %v322_v12, %v303_v11 }
  0xab   : > { %v342_v14 = vpop.f32.mrf.mxu3  ;;  %v362_v15 = vpop.f32.mrf.mxu0 }
  0xac   : > { %v343_v16 = vadd.f32 %v342_v14, %v323_v13 }
  0xad   : > { %v382_v17 = vpop.f32.mrf.mxu1 }
  0xae   : > { %v363_v18 = vadd.f32 %v362_v15, %v343_v16 }
  0xb0   : > { %v383_v19 = vadd.f32 %v382_v17, %v363_v18 }
  0xb1   : > { %v402_v20 = vpop.f32.mrf.mxu2 }
  0xb2   : > { %v403_v21 = vadd.f32 %v402_v20, %v383_v19 }
  0xb3   : > { %v422_v22 = vpop.f32.mrf.mxu3 }
  0xb4   : > { %v423_v24 = vadd.f32 %v422_v22, %v403_v21 }
  0xb6   : > { %v425_v25 = vadd.f32 %v423_v24, %v264_v23 }
  0xb8   : > { %427 = vst.msk [vmem:[#allocation2] sm:$0xff] %vm248_vm0, %v425_v25 }
  0xb9 PF: > { %p428_p3 = scmp.eq.s32.totalorder %s992_s12, 1 }
  0xba   : > { %v435_v26 = vld [vmem:[#allocation6 + $0x10] sm:$0xff] (%p428_p3)  ;;  %v436_v27 = vld [vmem:[#allocation6 + $0x18] sm:$0xff] (%p428_p3)  ;;  %v433_v28 = vld [vmem:[#allocation6] sm:$0xff] (%p428_p3) }
  0xbb   : > { %432 = sbr.rel (!%p428_p3) target bundleno = 329 (0x149), region = 48  ;;  %493 = vmatpush.xpose.msra.mxu2 (%p428_p3), %v435_v26  ;;  %513 = vmatpush.xpose.msra.mxu3 (%p428_p3), %v436_v27  ;;  %v434_v29 = vld [vmem:[#allocation6 + $0x8] sm:$0xff] (%p428_p3) }
  0xbc   : > { %453 = vmatpush.xpose.msra.mxu0 (%p428_p3), %v433_v28  ;;  %473 = vmatpush.xpose.msra.mxu1 (%p428_p3), %v434_v29 }
  0xbe   : > { %494 = vmatmul.f32.vlgmr.msra.gmra.mxu2 (%p428_p3), %v435_v26  ;;  %514 = vmatmul.f32.vlgmr.msra.gmra.mxu3 (%p428_p3), %v436_v27 }
  0xbf   : > { %454 = vmatmul.f32.vlgmr.msra.gmra.mxu0 (%p428_p3), %v433_v28  ;;  %474 = vmatmul.f32.vlgmr.msra.gmra.mxu1 (%p428_p3), %v434_v29  ;;  %v437_v36 = vld [vmem:[#allocation2] sm:$0xff] (%p428_p3) }
 0x13c   : > { %v455_v30 = vpop.f32.mrf.mxu0  ;;  %v475_v31 = vpop.f32.mrf.mxu1 }
 0x13d   : > { %v476_v32 = vadd.f32 %v475_v31, %v455_v30 }
 0x141   : > { %v495_v33 = vpop.f32.mrf.mxu2  ;;  %v515_v34 = vpop.f32.mrf.mxu3 }
 0x142   : > { %v496_v35 = vadd.f32 %v495_v33, %v476_v32 }
 0x144   : > { %v516_v37 = vadd.f32 %v515_v34, %v496_v35 }
 0x146   : > { %v518_v38 = vadd.f32 %v516_v37, %v437_v36 }
 0x148   : > { %520 = vst.msk [vmem:[#allocation2] sm:$0xff] %vm248_vm0, %v518_v38 }
 0x149 PF: > { %vm535_vm1 = vcmask 7168   ;;  %v552_v56 = vlaneseq  ;;  %s761_s16 = sshll.u32 %s992_s12, 3  ;;  %s643_s12 = sshll.u32 %s234_s7, 4  ;;  %s644_s12 = int_to_ptr.vmem [resolvable:$true] %s643_s12 }
 0x14a   : > { %s641_s23 = scalar_lea.hbm %s1153_s2, %s761_s16  ;;  %s631_s25 = scalar_lea.sflag [#allocation5], %s232_s5 }
 0x14b   : > { %v553_v58 = vshrl.u32 %v552_v56, 7  ;;  %v555_v59 = vand.u32 127, %v552_v56  ;;  %s645_s24 = sshll.u32 %s641_s23, 4  ;;  %s934_s30 = scalar_lea.hbm %s1153_s2, 16  ;;  %s646_s24 = int_to_ptr.hbm [resolvable:$true] %s645_s24 }
 0x14c   : > { %s928_s26 = sshra.s32 %s646_s24, 4  ;;  %s929_s26 = int_to_ptr.hbm [resolvable:$true] %s928_s26 }
 0x14d   : > { %vm556_vm2 = vcmp.eq.s32.totalorder %v553_v58, %v555_v59  ;;  %s930_s27 = scalar_lea.hbm %s929_s26, 8  ;;  %p935_p10 = scmp.lt.s32.totalorder %s929_s26, %s1153_s2 }
 0x14e   : > { %v759_v63 = vsel %vm556_vm2, 1.0, %v1004_v0  ;;  %p931_p5 = scmp.ne.s32.totalorder %s929_s26, %s930_s27  ;;  %p936_p11 = scmp.lt.s32.totalorder %s934_s30, %s930_s27 }
 0x14f   : > { %v524_v39 = vld [vmem:[#allocation2] sm:$0xff] }
 0x150   : > { %v526_v40 = vsel %vm248_vm0, %v524_v39, 0.0  ;;  %p932_p7 = pnand %p931_p5, %p1062_p4  ;;  %p937_p12 = por %p936_p11, %p935_p10 }
 0x151   : > { %527 = vadd.xlane.f32.xlu0 %v526_v40  ;;  %v529_v50 = vrot.slane %v526_v40, 4 }
 0x152   : > { %p933_p9 = pneg %p932_p7 }
 0x153   : > { %v530_v51 = vadd.f32 %v529_v50, %v526_v40 }
 0x154   : > { %p938_p13 = pnand %p937_p12, %p933_p9 }
 0x155   : > { %v531_v52 = vrot.slane %v530_v51, 2 }
 0x157   : > { %v532_v53 = vadd.f32 %v531_v52, %v530_v51 }
 0x159   : > { %v533_v54 = vrot.slane %v532_v53, 1 }
 0x15b   : > { %v534_v55 = vadd.f32 %v533_v54, %v532_v53 }
 0x1c4   : > { %v528_v41 = vpop.xlane.xlu0 %527 }
 0x1c5   : > { %v536_v42 = vsel %vm535_vm1, %v528_v41, 0.0  ;;  %v546_v57 = vadd.f32 %v534_v55, %v528_v41 }
 0x1c6   : > { %537 = vadd.xlane.f32.xlu0 %v536_v42 }
 0x1c7   : > { %v547_v60 = vmul.f32 0.125, %v546_v57 }
 0x1c9   : > { %v548_v61 = vsub.f32 %v524_v39, %v547_v60 }
 0x239   : > { %v538_v43 = vpop.xlane.xlu0 %537 }
 0x23a   : > { %v539_v44 = vrot.slane %v538_v43, 4 }
 0x23c   : > { %v540_v45 = vadd.f32 %v539_v44, %v538_v43 }
 0x23e   : > { %v541_v46 = vrot.slane %v540_v45, 2 }
 0x240   : > { %v542_v47 = vadd.f32 %v541_v46, %v540_v45 }
 0x242   : > { %v543_v48 = vrot.slane %v542_v47, 1 }
 0x244   : > { %v544_v49 = vadd.f32 %v543_v48, %v542_v47 }
 0x246   : > { %766 = vpush %v544_v49 }
 0x277   : > { %s767_s8 = spop %766 }
 0x278   : > { %s549_s15 = smul.f32 0.015625, %s767_s8 }
 0x27a   : > { %v550_v62 = vstv %s549_s15 }
 0x27b   : > { %v1102_v1 = vadd.f32 %v550_v62, %v548_v61 }
 0x27d   : > { %v559_v2 = vmul.f32 %v759_v63, %v1102_v1 }
 0x27f   : > { %v560_v3 = vsel %vm248_vm0, %v559_v2, 0.0 }
 0x280   : > { %561 = vadd.xlane.f32.xlu1 %v560_v3  ;;  %v564_v4 = vrot.slane %v560_v3, 4 }
 0x282   : > { %v565_v5 = vadd.f32 %v564_v4, %v560_v3 }
 0x284   : > { %v566_v6 = vrot.slane %v565_v5, 2 }
 0x286   : > { %v567_v7 = vadd.f32 %v566_v6, %v565_v5 }
 0x288   : > { %v568_v8 = vrot.slane %v567_v7, 1 }
 0x28a   : > { %v569_v9 = vadd.f32 %v568_v8, %v567_v7 }
 0x28c   : > { %v570_v10 = vmax.f32 %v569_v9, 0.0 }
 0x28e   : > { %846 = vrsqrt.f32 %v570_v10  ;;  %vm606_vm3 = vcmp.eq.f32.partialorder %v570_v10, inf  ;;  %v609_v20 = vand.u32 2147483648, %v570_v10  ;;  %vm608_vm4 = vcmp.eq.f32.partialorder %v570_v10, 0.0 }
 0x294   : > { %v847_v11 = vpop.eup %846 }
 0x295   : > { %v600_v12 = vmul.f32 %v847_v11, %v570_v10 }
 0x297   : > { %v601_v13 = vmul.f32 %v847_v11, %v600_v12 }
 0x299   : > { %v602_v14 = vmul.f32 0.5, %v601_v13 }
 0x29b   : > { %v603_v0 = vsub.f32 1.5, %v602_v14 }
 0x29d   : > { %v604_v15 = vmul.f32 %v847_v11, %v603_v0 }
 0x29f   : > { %v605_v18 = vmul.f32 %v604_v15, %v570_v10 }
 0x2a1   : > { %v607_v19 = vsel %vm606_vm3, %v570_v10, %v605_v18 }
 0x2a2   : > { %v610_v22 = vsel %vm608_vm4, %v609_v20, %v607_v19 }
 0x2a3   : > { %v611_v25 = vadd.f32 1e-06, %v610_v22 }
 0x2a5   : > { %vm617_vm9 = vweird.f32 %v611_v25  ;;  %v623_v45 = vand.u32 2147483648, %v611_v25  ;;  %v621_v47 = vand.u32 2147483647, %v611_v25 }
 0x2a7   : > { %v624_v52 = vor.u32 1.1754944e-38, %v623_v45  ;;  %vm622_vm14 = vcmp.eq.f32.partialorder %v621_v47, 8.507059e+37 }
 0x2f3   : > { %v562_v16 = vpop.xlane.xlu1 %561 }
 0x2f4   : > { %v563_v17 = vmax.f32 %v562_v16, 0.0 }
 0x2f6   : > { %848 = vrsqrt.f32 %v563_v17  ;;  %vm578_vm5 = vcmp.eq.f32.partialorder %v563_v17, inf  ;;  %v581_v30 = vand.u32 2147483648, %v563_v17  ;;  %vm580_vm6 = vcmp.eq.f32.partialorder %v563_v17, 0.0 }
 0x2f7   : > { %850 = vrcp.f32 %v611_v25 }
 0x2fc   : > { %v849_v21 = vpop.eup %848 }
 0x2fd   : > { %v572_v23 = vmul.f32 %v849_v21, %v563_v17  ;;  %v851_v31 = vpop.eup %850 }
 0x2fe   : > { %v613_v35 = vmul.f32 %v851_v31, %v611_v25  ;;  %vm618_vm7 = vweird.f32 %v851_v31 }
 0x2ff   : > { %v573_v24 = vmul.f32 %v849_v21, %v572_v23  ;;  %vm619_vm11 = vmor %vm617_vm9, %vm618_vm7 }
 0x300   : > { %v614_v36 = vsub.f32 1.0, %v613_v35 }
 0x301   : > { %v574_v26 = vmul.f32 0.5, %v573_v24 }
 0x302   : > { %v615_v39 = vmul.f32 %v851_v31, %v614_v36 }
 0x303   : > { %v575_v27 = vsub.f32 1.5, %v574_v26 }
 0x304   : > { %v616_v44 = vadd.f32 %v851_v31, %v615_v39 }
 0x305   : > { %v576_v28 = vmul.f32 %v849_v21, %v575_v27 }
 0x306   : > { %v620_v50 = vsel %vm619_vm11, %v851_v31, %v616_v44 }
 0x307   : > { %v577_v29 = vmul.f32 %v576_v28, %v563_v17  ;;  %v625_v54 = vsel %vm622_vm14, %v624_v52, %v620_v50 }
 0x309   : > { %v579_v32 = vsel %vm578_vm5, %v563_v17, %v577_v29 }
 0x30a   : > { %v582_v33 = vsel %vm580_vm6, %v581_v30, %v579_v32 }
 0x30b   : > { %v583_v34 = vadd.f32 1e-06, %v582_v33 }
 0x30d   : > { %852 = vrcp.f32 %v583_v34  ;;  %v595_v41 = vand.u32 2147483648, %v583_v34  ;;  %v593_v43 = vand.u32 2147483647, %v583_v34  ;;  %vm589_vm10 = vweird.f32 %v583_v34 }
 0x30f   : > { %v596_v48 = vor.u32 1.1754944e-38, %v595_v41  ;;  %vm594_vm13 = vcmp.eq.f32.partialorder %v593_v43, 8.507059e+37 }
 0x313   : > { %v853_v37 = vpop.eup %852 }
 0x314   : > { %v585_v38 = vmul.f32 %v853_v37, %v583_v34  ;;  %vm590_vm8 = vweird.f32 %v853_v37 }
 0x315   : > { %vm591_vm12 = vmor %vm589_vm10, %vm590_vm8 }
 0x316   : > { %v586_v40 = vsub.f32 1.0, %v585_v38 }
 0x318   : > { %v587_v42 = vmul.f32 %v853_v37, %v586_v40 }
 0x31a   : > { %v588_v46 = vadd.f32 %v853_v37, %v587_v42 }
 0x31c   : > { %v592_v49 = vsel %vm591_vm12, %v853_v37, %v588_v46 }
 0x31d   : > { %v597_v51 = vsel %vm594_vm13, %v596_v48, %v592_v49 }
 0x31e   : > { %v627_v53 = vmul.f32 %v597_v51, %v1102_v1 }
 0x320   : > { %v628_v55 = vmul.f32 %v627_v53, %v625_v54 }
 0x322   : > { %629 = vst.msk [vmem:[%s234_s7] sm:$0xff] %vm248_vm0, %v628_v55 }
 0x323   : > { %941 = shalt.err (!%p938_p13)
}
 0x324   : > { %776 = dma.vmem_to_hbm [thread:$0]  (%p1062_p4), %s644_s12, 128, %s646_s24, %s631_s25  }
 0x325 PF: > { %s657_s5 = sand.u32 1, %s980_s9   ;;  %p786_p0 = pnand %p750_p6, %p1069_p8 }
 0x326   : > { %s658_s6 = scalar_lea.sflag [#allocation5], %s657_s5 }
 0x327   : > { %p787_p1 = pneg %p786_p0 }
 0x329   : > { %975 = dma.done.wait (%p787_p1), %s658_s6, 128  }
 0x32a   : > { %977 = vsyncadd (%p787_p1), %s658_s6, 4294967168  ;;  %s21_s14 = sadd.s32 1, %s1000_s14   ;;  %s1156_s9 = smov %s984_s10 }
 0x32b   : > { %p18_p2 = scmp.ge.s32.totalorder %s21_s14, 4   ;;  %s1157_s10 = smov %s988_s11 }
 0x32c   : > { %s1158_s11 = smov %s1075_s22  ;;  %s1159_s12 = smov %s996_s13 }
 0x32d   : > { %s1160_s13 = smov %s1162_s17  ;;  %20 = sbr.rel (!%p18_p2) target bundleno = 8 (0x8), region = 102 }
 0x332   :  { %664 = vsyncpa [#allocation4], 1 }
 0x333   :  { %666 = vsyncpa [#allocation4 + $0x1], 1 }
 0x334   :  { %667 = vsyncpa [#allocation7], 1 }
 0x335   :  { %669 = vsyncpa [#allocation7 + $0x1], 1 }
 0x336   :  { %670 = vsyncpa [#allocation5], 1 }
 0x337   :  { %672 = vsyncpa [#allocation5 + $0x1], 1 }

</bundles_post_ra>
